<compile_context>
chip_gen: v6e
topology: v6e:2x2x1
jax: 0.10.0
libtpu: 0.0.40
codegen_flags: <defaults>
</compile_context>

<pallas_src>
import jax
import jax.numpy as jnp
from jax.experimental import pallas as pl
from jax.experimental.pallas import tpu as pltpu


# --------------------------- hardware-aware constants --------------------------

def _device_kind():
    try:
        for d in jax.devices():
            if d.platform == "tpu":
                return d.device_kind.lower()
    except Exception:
        pass
    return ""


_KIND = _device_kind()
# bf16-capable VPU/EUP on v6e and newer; older / unknown chips upcast to f32.
_BF16_NATIVE = any(tag in _KIND for tag in ("v6", "v7"))


def _vmem_capacity_bytes():
    try:
        return int(pltpu.get_tpu_info().vmem_capacity_bytes)
    except Exception:
        return 64 << 20   # conservative (v7x per-core physical VMEM)


_VMEM_PHYS = max(_vmem_capacity_bytes(), 64 << 20)
# ~6 MiB blocks on 128-MiB-VMEM chips (v5e/v6e), ~4 MiB on 64-MiB v7x cores.
_TARGET_TILE_BYTES = (6 << 20) if _VMEM_PHYS >= (96 << 20) else (4 << 20)
# Cover 2 buffers x (in + out) plus headroom, but stay well under physical VMEM.
_VMEM_LIMIT_BYTES = int(min(_VMEM_PHYS - (16 << 20), 4 * _TARGET_TILE_BYTES + (16 << 20)))

_PREFERRED_COLS = (1024, 512, 256, 128)   # lane-dense last dims (multiples of 128)


# ----------------------------------- kernels -----------------------------------

def _make_kernel(act_type, in_dtype):
    if act_type == "relu":
        def relu_kernel(x_ref, o_ref):
            # scalar 0 -> no broadcast zeros tile materialized
            o_ref[...] = jnp.maximum(x_ref[...], 0)
        return relu_kernel

    # sigmoid / tanh: bf16-native on v6e/v7x, f32 upcast otherwise.
    if in_dtype == jnp.float32 or (in_dtype == jnp.bfloat16 and _BF16_NATIVE):
        compute_dtype = in_dtype
    else:
        compute_dtype = jnp.float32

    if act_type == "sigmoid":
        def sigmoid_kernel(x_ref, o_ref):
            x = x_ref[...].astype(compute_dtype)
            o_ref[...] = jax.nn.sigmoid(x).astype(o_ref.dtype)   # EUP logistic
        return sigmoid_kernel

    def tanh_kernel(x_ref, o_ref):
        x = x_ref[...].astype(compute_dtype)
        o_ref[...] = jnp.tanh(x).astype(o_ref.dtype)              # EUP tanh
    return tanh_kernel


def _jnp_activation(v, act_type, dtype):
    """Plain-jnp fallback for the <128-element ragged tail."""
    if act_type == "relu":
        return jnp.maximum(v, 0).astype(dtype)
    if dtype == jnp.float32 or (dtype == jnp.bfloat16 and _BF16_NATIVE):
        cd = dtype
    else:
        cd = jnp.float32
    v = v.astype(cd)
    y = jax.nn.sigmoid(v) if act_type == "sigmoid" else jnp.tanh(v)
    return y.astype(dtype)


# ----------------------------------- tiling ------------------------------------

def _choose_layout(n_aligned):
    """Lane-dense [rows, cols] for a 128-aligned element count (no padding)."""
    for c in _PREFERRED_COLS:
        if n_aligned % c == 0:
            return c, n_aligned // c
    return 128, n_aligned // 128   # unreachable: n_aligned is a multiple of 128


def _row_tiling(rows, cols, itemsize):
    """Row-block size (multiple of 8 sublanes) and grid length."""
    max_tile_rows = max(8, (_TARGET_TILE_BYTES // (cols * itemsize)) // 8 * 8)
    if rows <= 8:
        return rows, 1                 # tiny slab: full-extent single block
    # Guarantee >= 2 blocks so both v7x TensorCores stream HBM in parallel.
    half_rows = max(8, pl.cdiv(pl.cdiv(rows, 2), 8) * 8)
    tile_rows = min(max_tile_rows, half_rows)
    return tile_rows, pl.cdiv(rows, tile_rows)


# ----------------------------------- wrapper ------------------------------------

def activation(x, act_type):
    """Elementwise activation matching Activation(type).forward(x) semantics."""
    if act_type not in ("relu", "sigmoid", "tanh"):
        raise NotImplementedError(
            "activation type should be one of [sigmoid, tanh, relu]"
        )

    orig_shape = x.shape
    dtype = x.dtype
    n = x.size
    if n == 0:
        return x

    x_flat = jnp.ravel(x)
    n_main = (n // 128) * 128          # 128-aligned prefix handled by the kernel
    itemsize = jnp.dtype(dtype).itemsize

    out_parts = []
    if n_main:
        x_main = x_flat if n_main == n else x_flat[:n_main]
        cols, rows = _choose_layout(n_main)
        x2d = x_main.reshape(rows, cols)
        tile_rows, num_blocks = _row_tiling(rows, cols, itemsize)

        kernel = _make_kernel(act_type, dtype)
        cost = pl.CostEstimate(
            flops=n_main,
            transcendentals=0 if act_type == "relu" else n_main,
            bytes_accessed=2 * n_main * itemsize,
        )

        out2d = pl.pallas_call(
            kernel,
            out_shape=jax.ShapeDtypeStruct((rows, cols), dtype),
            grid_spec=pl.GridSpec(
                grid=(num_blocks,),
                in_specs=[pl.BlockSpec((tile_rows, cols), lambda i: (i, 0))],
                out_specs=pl.BlockSpec((tile_rows, cols), lambda i: (i, 0)),
            ),
            compiler_params=pltpu.CompilerParams(
                dimension_semantics=("parallel",),       # v7x shards blocks across TCs
                vmem_limit_bytes=_VMEM_LIMIT_BYTES,
            ),
            cost_estimate=cost,
        )(x2d)
        out_parts.append(out2d.reshape(-1))

    if n_main < n:
        # < 128-element ragged tail: plain jnp (no pad+kernel+slice round-trip).
        out_parts.append(_jnp_activation(x_flat[n_main:], act_type, dtype))

    out_flat = out_parts[0] if len(out_parts) == 1 else jnp.concatenate(out_parts)
    return out_flat.reshape(orig_shape)


# -------------------------------- demo / check ----------------------------------

if __name__ == "__main__":
    key = jax.random.PRNGKey(0)
    ok = True

    ref_fns = {
        "relu": lambda v: jnp.maximum(v, 0.0),
        "sigmoid": jax.nn.sigmoid,
        "tanh": jnp.tanh,
    }

    shapes = [
        (2, 4, 16, 16),   # lane-aligned NCHW, single block
        (4, 8, 64, 64),   # lane-aligned, >=2 parallel blocks
        (2, 9, 128),      # lane-aligned, ragged (masked) last block
        (3, 5, 7),        # tiny ragged input (tail-only path)
        (5, 131),         # aligned prefix + <128-element tail
    ]
    for shape in shapes:
        key, sub = jax.random.split(key)
        x = jax.random.normal(sub, shape, dtype=jnp.float32)
        for name, ref in ref_fns.items():
            y = jax.block_until_ready(activation(x, name))
            y_ref = ref(x)
            if y.shape != x.shape or y.dtype != x.dtype:
                ok = False
            if not jnp.allclose(y, y_ref, atol=1e-5, rtol=1e-5):
                ok = False

    # bf16 path (bf16-native transcendentals on v6e/v7x, f32 upcast elsewhere).
    key, sub = jax.random.split(key)
    xb = jax.random.normal(sub, (2, 4, 16, 16), dtype=jnp.bfloat16)
    for name, ref in ref_fns.items():
        y = jax.block_until_ready(activation(xb, name))
        y_ref = ref(xb.astype(jnp.float32)).astype(jnp.bfloat16)
        if y.shape != xb.shape or y.dtype != xb.dtype:
            ok = False
        if not jnp.allclose(y.astype(jnp.float32), y_ref.astype(jnp.float32),
                            atol=2e-2, rtol=2e-2):
            ok = False

    if ok:
        print("KERNEL_OK")
</pallas_src>

<mosaic_0001>
module attributes {stable_mosaic.version = 11 : i64} {
  func.func @relu_kernel(%arg0: i32, %arg1: memref<2x1024xf32, #tpu.memory_space<vmem>>, %arg2: memref<2x1024xf32, #tpu.memory_space<vmem>>) attributes {dimension_semantics = [#tpu.dimension_semantics<parallel>], iteration_bounds = array<i64: 1>, scalar_prefetch = 0 : i64, scratch_operands = 0 : i64, tpu.core_type = #tpu.core_type<tc>, window_params = [{transform_indices = @transform_0, window_bounds = array<i64: 2, 1024>}, {transform_indices = @transform_1, window_bounds = array<i64: 2, 1024>}]} {
    %c0 = arith.constant 0 : index
    %c0_0 = arith.constant 0 : index
    %0 = vector.load %arg1[%c0, %c0_0] : memref<2x1024xf32, #tpu.memory_space<vmem>>, vector<2x1024xf32>
    %cst = arith.constant 0.000000e+00 : f32
    %1 = vector.broadcast %cst : f32 to vector<2x1024xf32>
    %2 = arith.maximumf %0, %1 : vector<2x1024xf32>
    %c0_1 = arith.constant 0 : index
    %c0_2 = arith.constant 0 : index
    %3 = vector.load %arg2[%c0_1, %c0_2] : memref<2x1024xf32, #tpu.memory_space<vmem>>, vector<2x1024xf32>
    tpu.vector_store %arg2[%c0_1, %c0_2], %2 {strides = array<i32>} : memref<2x1024xf32, #tpu.memory_space<vmem>>, vector<2x1024xf32>,
    return
  }
  func.func @transform_0(%arg0: i32) -> (i32, i32) {
    %c0_i32 = arith.constant 0 : i32
    %c0_i32_0 = arith.constant 0 : i32
    return %arg0, %c0_i32 : i32, i32
  }
  func.func @transform_1(%arg0: i32) -> (i32, i32) {
    %c0_i32 = arith.constant 0 : i32
    %c0_i32_0 = arith.constant 0 : i32
    return %arg0, %c0_i32 : i32, i32
  }
}

</mosaic_0001>

<bundles_post_ra>
// kernel: tpu_custom_call.1
= control target key start
LH: loop header
LB: loop body
LE: loop exit
PB: predicated region body
PF: predicated region fallthrough
CT: control target
= control target key end

     0   :  { %6 = vsyncpa [#allocation3], 0  ;;  %s106_s0 = inlined_call_operand.hbm [shape: f32[2,1024], index: 0, kind: input, shape index: {}]   ;;  %s107_s1 = inlined_call_operand.hbm [shape: f32[2,1024], index: 1, kind: output, shape index: {}]  }
   0x1   :  { %7 = vsyncpa [#allocation4], 0  ;;  %s88_s6 = smov [#allocation2]  }
   0x2   :  { %s14_s7 = sshll.u32 %s88_s6, 4  ;;  %s15_s7 = int_to_ptr.vmem [resolvable:$true] %s14_s7 }
   0x3   :  { %s52_s8 = scalar_lea.vmem %s15_s7, 256  ;;  %p57_p1 = scmp.lt.s32.totalorder %s15_s7, %s15_s7 }
   0x4   :  { %p53_p0 = scmp.ne.s32.totalorder %s15_s7, %s52_s8  ;;  %p58_p2 = scmp.lt.s32.totalorder %s52_s8, %s52_s8 }
   0x6   :  { %p59_p3 = por %p58_p2, %p57_p1 }
   0x8   :  { %p60_p4 = pnand %p59_p3, %p53_p0 }
   0xa   :  { %63 = shalt.err (!%p60_p4)
}
   0xb   :  { %17 = dma.hbm_to_vmem [thread:$0]  %s106_s0, 256, %s15_s7, [#allocation3]  }
   0xc   :  { %84 = dma.done.wait [#allocation3], 256  }
   0xd   :  { %85 = vsyncadd [#allocation3], 4294967040  ;;  %s89_s11 = smov [#allocation5]   ;;  %v21_v0 = vld [vmem:[#allocation2] sm:$0xff]  ;;  %v22_v1 = vld [vmem:[#allocation2 + $0x8] sm:$0xff] }
   0xe   :  { %s33_s12 = sshll.u32 %s89_s11, 4  ;;  %v23_v2 = vmax.f32 %v21_v0, 0.0  ;;  %v24_v3 = vmax.f32 %v22_v1, 0.0  ;;  %s34_s12 = int_to_ptr.vmem [resolvable:$true] %s33_s12 }
   0xf   :  { %s64_s13 = scalar_lea.vmem %s34_s12, 256  ;;  %p69_p6 = scmp.lt.s32.totalorder %s34_s12, %s34_s12 }
  0x10   :  { %25 = vst [vmem:[#allocation5] sm:$0xff] %v23_v2  ;;  %26 = vst [vmem:[#allocation5 + $0x8] sm:$0xff] %v24_v3  ;;  %p65_p5 = scmp.ne.s32.totalorder %s34_s12, %s64_s13  ;;  %p70_p7 = scmp.lt.s32.totalorder %s64_s13, %s64_s13 }
  0x12   :  { %p71_p8 = por %p70_p7, %p69_p6 }
  0x14   :  { %p72_p9 = pnand %p71_p8, %p65_p5 }
  0x16   :  { %75 = shalt.err (!%p72_p9)
}
  0x17   :  { %36 = dma.vmem_to_hbm [thread:$0]  %s34_s12, 256, %s107_s1, [#allocation4]  }
  0x18   :  { %86 = dma.done.wait [#allocation4], 256  }
  0x19   :  { %87 = vsyncadd [#allocation4], 4294967040 }
  0x1a   :  { %40 = vsyncpa [#allocation3], 1 }
  0x1b   :  { %41 = vsyncpa [#allocation4], 1 }

</bundles_post_ra>
